<compile_context>
chip_gen: v7x
topology: tpu7x:2x2x1
jax: 0.10.0
libtpu: 0.0.40
codegen_flags: <defaults>
</compile_context>

<pallas_src>
import functools

import jax
import jax.numpy as jnp
from jax.experimental import pallas as pl
from jax.experimental.pallas import tpu as pltpu

_LANE = 128
_SUBLANE = 8


def _round_up(n, m):
    return -(-n // m) * m


def _policy_net_kernel(x_ref, w1_ref, w2_ref, w3_ref, b_ref, o_ref, *,
                       fc1_dims, fc2_dims, n_actions, off1, off2, off3):
    # Packed biases: one (1, total) block, one DMA.  Offsets are multiples of
    # 128 so these static ref slices start on lane boundaries (no shuffles).
    b1 = b_ref[:, off1:off1 + fc1_dims]
    b2 = b_ref[:, off2:off2 + fc2_dims]
    b3 = b_ref[:, off3:off3 + n_actions]

    # fc1 + ReLU
    h1 = jnp.dot(x_ref[...], w1_ref[...],
                 preferred_element_type=jnp.float32) + b1
    h1 = jnp.maximum(h1, 0.0)
    # fc2 + ReLU
    h2 = jnp.dot(h1, w2_ref[...],
                 preferred_element_type=jnp.float32) + b2
    h2 = jnp.maximum(h2, 0.0)
    # fc3 (logits, no activation)
    o_ref[...] = (jnp.dot(h2, w3_ref[...],
                          preferred_element_type=jnp.float32)
                  + b3).astype(o_ref.dtype)


def policy_net_forward(x, params, *, batch_tile=4096):
    """Forward pass.

    x: [B, D_in]; params: dict from init_params() with kernel-ready layout:
       w1/w2/w3 stored [in, out], b_packed a single (1, total) lane-aligned
       bias array (b1/b2/b3 also kept for reference math).
    """
    w1, w2, w3 = params["w1"], params["w2"], params["w3"]
    b_packed = params["b_packed"]

    d_in, fc1_dims = w1.shape
    fc2_dims = w2.shape[1]
    n_actions = w3.shape[1]

    # Lane-aligned offsets of each bias segment inside b_packed.
    off1 = 0
    off2 = _round_up(fc1_dims, _LANE)
    off3 = off2 + _round_up(fc2_dims, _LANE)

    x = x.astype(jnp.float32)
    B = x.shape[0]

    # Tile selection (no wrapper-side pad/slice in either path):
    #  * B <= batch_tile: one block covering the whole batch ("block equals
    #    full array dim" exemption) — single grid step, zero wasted rows.
    #  * B  > batch_tile: tb is a multiple of 8; grid = cdiv(B, tb) and Mosaic
    #    pads reads / masks writes on the ragged last block.  Rows are
    #    independent, so any padded-row garbage never contaminates valid rows.
    batch_tile = _round_up(batch_tile, _SUBLANE)
    if B <= batch_tile:
        tb = B
    else:
        tb = batch_tile
    grid = (pl.cdiv(B, tb),)

    kernel = functools.partial(
        _policy_net_kernel,
        fc1_dims=fc1_dims, fc2_dims=fc2_dims, n_actions=n_actions,
        off1=off1, off2=off2, off3=off3)

    # Weights / packed bias: constant block index -> VMEM-resident across the
    # batch grid, and single-buffered (the default double buffer would be dead
    # VMEM + a dead second DMA buffer for a never-changing block).
    def const(shape):
        return pl.BlockSpec(shape, lambda i: (0,) * len(shape),
                            pipeline_mode=pl.Buffered(1))

    out = pl.pallas_call(
        kernel,
        out_shape=jax.ShapeDtypeStruct((B, n_actions), jnp.float32),
        grid_spec=pltpu.PrefetchScalarGridSpec(
            num_scalar_prefetch=0,
            grid=grid,
            in_specs=[
                pl.BlockSpec((tb, d_in), lambda i: (i, 0)),   # x rows
                const((d_in, fc1_dims)),                      # w1
                const((fc1_dims, fc2_dims)),                  # w2
                const((fc2_dims, n_actions)),                 # w3
                const((1, b_packed.shape[1])),                # packed biases
            ],
            out_specs=pl.BlockSpec((tb, n_actions), lambda i: (i, 0)),
        ),
        # Multi-step grids only exist when B > batch_tile (>= ~2k rows per TC
        # on v7x), so "parallel" never splits trivially small work; it is a
        # no-op on single-step grids and on 1-TC v5e/v6e.
        compiler_params=pltpu.CompilerParams(
            dimension_semantics=("parallel",)),
    )(x, w1, w2, w3, b_packed)
    return out


def init_params(key, input_dims, fc1_dims, fc2_dims, n_actions):
    """PyTorch-Linear-style init U(-1/sqrt(fan_in), 1/sqrt(fan_in)), but stored
    kernel-ready: weights [in, out], biases packed once (no per-call work)."""
    ks = jax.random.split(key, 6)

    def lin(kw, kb, fan_in, fan_out):
        bound = 1.0 / jnp.sqrt(jnp.float32(fan_in))
        # Stored directly as [in, out] so the kernel computes y = x @ W + b.
        w = jax.random.uniform(kw, (fan_in, fan_out), jnp.float32, -bound, bound)
        b = jax.random.uniform(kb, (fan_out,), jnp.float32, -bound, bound)
        return w, b

    w1, b1 = lin(ks[0], ks[1], input_dims, fc1_dims)
    w2, b2 = lin(ks[2], ks[3], fc1_dims, fc2_dims)
    w3, b3 = lin(ks[4], ks[5], fc2_dims, n_actions)

    def pad_lane(b):
        return jnp.pad(b, (0, _round_up(b.shape[0], _LANE) - b.shape[0]))

    b_packed = jnp.concatenate(
        [pad_lane(b1), pad_lane(b2), pad_lane(b3)]).reshape(1, -1)

    return {"w1": w1, "w2": w2, "w3": w3,
            "b1": b1, "b2": b2, "b3": b3,
            "b_packed": b_packed}


def _reference(x, params):
    h = jnp.maximum(x @ params["w1"] + params["b1"], 0.0)
    h = jnp.maximum(h @ params["w2"] + params["b2"], 0.0)
    return h @ params["w3"] + params["b3"]


if __name__ == "__main__":
    key = jax.random.PRNGKey(0)
    k_x, k_xb, k_p = jax.random.split(key, 3)

    # Shapes consistent with PolicyNet(ALPHA, input_dims=(8,), n_actions=4,
    # fc1_dims=32, fc2_dims=32); small batch of 4 observations.
    B, input_dims, fc1_dims, fc2_dims, n_actions = 4, 8, 32, 32, 4

    params = init_params(k_p, input_dims, fc1_dims, fc2_dims, n_actions)
    x = jax.random.normal(k_x, (B, input_dims), dtype=jnp.float32)

    out = policy_net_forward(x, params)
    out = jax.block_until_ready(out)
    assert out.shape == (B, n_actions)
    assert jnp.allclose(out, _reference(x, params), atol=1e-5, rtol=1e-5)

    # Realistic batch: with the raised batch_tile this is a single 300-row
    # block — no padding, no wrapper pad/slice, one grid step.
    xb = jax.random.normal(k_xb, (300, input_dims), dtype=jnp.float32)
    outb = jax.block_until_ready(policy_net_forward(xb, params))
    assert outb.shape == (300, n_actions)
    assert jnp.allclose(outb, _reference(xb, params), atol=1e-5, rtol=1e-5)

    # Force the multi-step ragged-grid path (tb=128, grid=(3,), last block
    # masked by Mosaic) to validate the no-pad / no-slice batched path.
    outg = jax.block_until_ready(policy_net_forward(xb, params, batch_tile=128))
    assert outg.shape == (300, n_actions)
    assert jnp.allclose(outg, _reference(xb, params), atol=1e-5, rtol=1e-5)

    print("KERNEL_OK")
</pallas_src>

<mosaic_0001>
module attributes {stable_mosaic.version = 11 : i64} {
  func.func @_policy_net_kernel(%arg0: i32, %arg1: memref<4x8xf32, #tpu.memory_space<vmem>>, %arg2: memref<8x32xf32, #tpu.memory_space<vmem>>, %arg3: memref<32x32xf32, #tpu.memory_space<vmem>>, %arg4: memref<32x4xf32, #tpu.memory_space<vmem>>, %arg5: memref<1x384xf32, #tpu.memory_space<vmem>>, %arg6: memref<4x4xf32, #tpu.memory_space<vmem>>) attributes {dimension_semantics = [#tpu.dimension_semantics<parallel>], iteration_bounds = array<i64: 1>, scalar_prefetch = 0 : i64, scratch_operands = 0 : i64, tpu.core_type = #tpu.core_type<tc>, window_params = [{transform_indices = @transform_0, window_bounds = array<i64: 4, 8>}, {pipeline_mode = #tpu.pipeline_mode<synchronous>, transform_indices = @transform_1, window_bounds = array<i64: 8, 32>}, {pipeline_mode = #tpu.pipeline_mode<synchronous>, transform_indices = @transform_2, window_bounds = array<i64: 32, 32>}, {pipeline_mode = #tpu.pipeline_mode<synchronous>, transform_indices = @transform_3, window_bounds = array<i64: 32, 4>}, {pipeline_mode = #tpu.pipeline_mode<synchronous>, transform_indices = @transform_4, window_bounds = array<i64: 1, 384>}, {transform_indices = @transform_5, window_bounds = array<i64: 4, 4>}]} {
    %c0 = arith.constant 0 : index
    %c0_0 = arith.constant 0 : index
    %0 = vector.load %arg5[%c0, %c0_0] : memref<1x384xf32, #tpu.memory_space<vmem>>, vector<1x32xf32>
    %c0_1 = arith.constant 0 : index
    %c128 = arith.constant 128 : index
    %1 = vector.load %arg5[%c0_1, %c128] : memref<1x384xf32, #tpu.memory_space<vmem>>, vector<1x32xf32>
    %c0_2 = arith.constant 0 : index
    %c256 = arith.constant 256 : index
    %2 = vector.load %arg5[%c0_2, %c256] : memref<1x384xf32, #tpu.memory_space<vmem>>, vector<1x4xf32>
    %c0_3 = arith.constant 0 : index
    %c0_4 = arith.constant 0 : index
    %3 = vector.load %arg1[%c0_3, %c0_4] : memref<4x8xf32, #tpu.memory_space<vmem>>, vector<4x8xf32>
    %c0_5 = arith.constant 0 : index
    %c0_6 = arith.constant 0 : index
    %4 = vector.load %arg2[%c0_5, %c0_6] : memref<8x32xf32, #tpu.memory_space<vmem>>, vector<8x32xf32>
    %cst = arith.constant dense<0.000000e+00> : vector<4x32xf32>
    %5 = tpu.matmul %3, %4, %cst {dimension_numbers = #tpu.dot_dimension_numbers<[1], [0], [0], [1], [0, 0, 1, 1], [], []>} : vector<4x8xf32>, vector<8x32xf32>, vector<4x32xf32> -> vector<4x32xf32>
    %6 = vector.broadcast %0 : vector<1x32xf32> to vector<4x32xf32>
    %7 = arith.addf %5, %6 : vector<4x32xf32>
    %cst_7 = arith.constant 0.000000e+00 : f32
    %8 = vector.broadcast %cst_7 : f32 to vector<4x32xf32>
    %9 = arith.maximumf %7, %8 : vector<4x32xf32>
    %c0_8 = arith.constant 0 : index
    %c0_9 = arith.constant 0 : index
    %10 = vector.load %arg3[%c0_8, %c0_9] : memref<32x32xf32, #tpu.memory_space<vmem>>, vector<32x32xf32>
    %cst_10 = arith.constant dense<0.000000e+00> : vector<4x32xf32>
    %11 = tpu.matmul %9, %10, %cst_10 {dimension_numbers = #tpu.dot_dimension_numbers<[1], [0], [0], [1], [0, 0, 1, 1], [], []>} : vector<4x32xf32>, vector<32x32xf32>, vector<4x32xf32> -> vector<4x32xf32>
    %12 = vector.broadcast %1 : vector<1x32xf32> to vector<4x32xf32>
    %13 = arith.addf %11, %12 : vector<4x32xf32>
    %cst_11 = arith.constant 0.000000e+00 : f32
    %14 = vector.broadcast %cst_11 : f32 to vector<4x32xf32>
    %15 = arith.maximumf %13, %14 : vector<4x32xf32>
    %c0_12 = arith.constant 0 : index
    %c0_13 = arith.constant 0 : index
    %16 = vector.load %arg4[%c0_12, %c0_13] : memref<32x4xf32, #tpu.memory_space<vmem>>, vector<32x4xf32>
    %cst_14 = arith.constant dense<0.000000e+00> : vector<4x4xf32>
    %17 = tpu.matmul %15, %16, %cst_14 {dimension_numbers = #tpu.dot_dimension_numbers<[1], [0], [0], [1], [0, 0, 1, 1], [], []>} : vector<4x32xf32>, vector<32x4xf32>, vector<4x4xf32> -> vector<4x4xf32>
    %18 = vector.broadcast %2 : vector<1x4xf32> to vector<4x4xf32>
    %19 = arith.addf %17, %18 : vector<4x4xf32>
    %c0_15 = arith.constant 0 : index
    %c0_16 = arith.constant 0 : index
    %20 = vector.load %arg6[%c0_15, %c0_16] : memref<4x4xf32, #tpu.memory_space<vmem>>, vector<4x4xf32>
    tpu.vector_store %arg6[%c0_15, %c0_16], %19 {strides = array<i32>} : memref<4x4xf32, #tpu.memory_space<vmem>>, vector<4x4xf32>,
    return
  }
  func.func @transform_0(%arg0: i32) -> (i32, i32) {
    %c0_i32 = arith.constant 0 : i32
    %c0_i32_0 = arith.constant 0 : i32
    return %arg0, %c0_i32 : i32, i32
  }
  func.func @transform_1(%arg0: i32) -> (i32, i32) {
    %c0_i32 = arith.constant 0 : i32
    %c0_i32_0 = arith.constant 0 : i32
    %c0_i32_1 = arith.constant 0 : i32
    return %c0_i32, %c0_i32_0 : i32, i32
  }
  func.func @transform_2(%arg0: i32) -> (i32, i32) {
    %c0_i32 = arith.constant 0 : i32
    %c0_i32_0 = arith.constant 0 : i32
    %c0_i32_1 = arith.constant 0 : i32
    return %c0_i32, %c0_i32_0 : i32, i32
  }
  func.func @transform_3(%arg0: i32) -> (i32, i32) {
    %c0_i32 = arith.constant 0 : i32
    %c0_i32_0 = arith.constant 0 : i32
    %c0_i32_1 = arith.constant 0 : i32
    return %c0_i32, %c0_i32_0 : i32, i32
  }
  func.func @transform_4(%arg0: i32) -> (i32, i32) {
    %c0_i32 = arith.constant 0 : i32
    %c0_i32_0 = arith.constant 0 : i32
    %c0_i32_1 = arith.constant 0 : i32
    return %c0_i32, %c0_i32_0 : i32, i32
  }
  func.func @transform_5(%arg0: i32) -> (i32, i32) {
    %c0_i32 = arith.constant 0 : i32
    %c0_i32_0 = arith.constant 0 : i32
    return %arg0, %c0_i32 : i32, i32
  }
}

</mosaic_0001>

<bundles_post_ra>
// kernel: tpu_custom_call.1
= control target key start
LH: loop header
LB: loop body
LE: loop exit
PB: predicated region body
PF: predicated region fallthrough
CT: control target
= control target key end

     0   :  { %10 = vsyncpa [#allocation3], 0  ;;  %s509_s0 = inlined_call_operand.hbm [shape: f32[4,8], index: 0, kind: input, shape index: {}]   ;;  %s510_s1 = inlined_call_operand.vmem [shape: f32[8,32], index: 1, kind: input, shape index: {}]   ;;  %s511_s2 = inlined_call_operand.vmem [shape: f32[32,32], index: 2, kind: input, shape index: {}]   ;;  %s512_s3 = inlined_call_operand.vmem [shape: f32[32,4], index: 3, kind: input, shape index: {}]   ;;  %s513_s4 = inlined_call_operand.vmem [shape: f32[1,384], index: 4, kind: input, shape index: {}]   ;;  %s514_s5 = inlined_call_operand.hbm [shape: f32[4,4], index: 5, kind: output, shape index: {}]  }
   0x1   :  { %11 = vsyncpa [#allocation4], 0  ;;  %s414_s18 = smov [#allocation2]   ;;  %s366_s22 = scalar_lea.hbm %s509_s0, 64 }
   0x2   :  { %s18_s19 = sshll.u32 %s414_s18, 4  ;;  %p367_p0 = scmp.ne.s32.totalorder %s509_s0, %s366_s22  ;;  %s19_s19 = int_to_ptr.vmem [resolvable:$true] %s18_s19 }
   0x3   :  { %p370_p1 = scmp.lt.u32.totalorder %s366_s22, %s509_s0 }
   0x5   :  { %p372_p2 = pnand %p370_p1, %p367_p0 }
   0x7   :  { %375 = shalt.err (!%p372_p2)
}
   0x8   :  { %s376_s27 = scalar_lea.vmem %s19_s19, 64  ;;  %p381_p4 = scmp.lt.s32.totalorder %s19_s19, %s19_s19 }
   0x9   :  { %p377_p3 = scmp.ne.s32.totalorder %s19_s19, %s376_s27  ;;  %p382_p5 = scmp.lt.s32.totalorder %s376_s27, %s376_s27 }
   0xb   :  { %p383_p6 = por %p382_p5, %p381_p4 }
   0xd   :  { %p384_p7 = pnand %p383_p6, %p377_p3 }
   0xf   :  { %387 = shalt.err (!%p384_p7)
}
  0x10   :  { %21 = dma.hbm_to_vmem [thread:$0]  %s509_s0, 64, %s19_s19, [#allocation3]  }
  0x11   :  { %410 = dma.done.wait [#allocation3], 64  }
  0x12   :  { %411 = vsyncadd [#allocation3], 4294967232  ;;  %v415_v0 = vmov 0.0   ;;  %vm416_vm0 = vmmov 0   ;;  %v417_v1 = vmov 0.0|0.0   ;;  %vm44_vm1 = vcmask 64512  }
  0x13   :  { %322 = vmatprep.subr.mxu0 %v415_v0  ;;  %324 = vmatprep.mubr.msk.f32.mxu0 %vm416_vm0, %v415_v0  ;;  %v37_v2 = vld [vmem:[%s510_s1] sm:$0xff]  ;;  %v120_v5 = vld [vmem:[%s511_s2 + $0x8] sm:$0xff]  ;;  %v121_v7 = vld [vmem:[%s511_s2 + $0x10] sm:$0xff]  ;;  %vm129_vm2 = vcmask 261120   ;;  %s418_s26 = smov [#allocation5]   ;;  %vm287_vm3 = vcmask 27648  }
  0x14   :  { %349 = vmatprep.subr.bf16.mxu1 %v417_v1  ;;  %335 = vmatprep.mubr.msk.f32.mxu1 %vm416_vm0, %v415_v0  ;;  %v36_v3 = vld [vmem:[#allocation2] sm:$0xf]  ;;  %v122_v8 = vld [vmem:[%s511_s2 + $0x18] sm:$0xff]  ;;  %v205_v11 = vld [vmem:[%s512_s3 + $0x8] sm:$0xff]  ;;  %s295_s27 = sshll.u32 %s418_s26, 4  ;;  %s296_s27 = int_to_ptr.vmem [resolvable:$true] %s295_s27 }
  0x15   :  { %v119_v4 = vld [vmem:[%s511_s2] sm:$0xff]  ;;  %323 = vmatpush3.msra.mxu0 %v37_v2  ;;  %v353_v9 = vpack.c.bf16 %v122_v8, %v121_v7  ;;  %v206_v18 = vld [vmem:[%s512_s3 + $0x10] sm:$0xff]  ;;  %v207_v19 = vld [vmem:[%s512_s3 + $0x18] sm:$0xff]  ;;  %p393_p9 = scmp.lt.s32.totalorder %s296_s27, %s296_s27 }
  0x16   :  { %325 = vmatmul.mubr.msk.f32.vlgmr.msra.gmra.mrb[0].mxu0 %vm44_vm1, %v36_v3  ;;  %v350_v6 = vpack.c.bf16 %v120_v5, %v119_v4  ;;  %355 = vmatprep.subr.bf16.mxu0 %v417_v1  ;;  %v204_v10 = vld [vmem:[%s512_s3] sm:$0xff]  ;;  %v359_v20 = vpack.c.bf16 %v207_v19, %v206_v18  ;;  %s388_s3 = scalar_lea.vmem %s296_s27, 64 }
  0x17   :  { %346 = vmatprep.mubr.msk.f32.mxu0 %vm416_vm0, %v415_v0  ;;  %v356_v12 = vpack.c.bf16 %v205_v11, %v204_v10  ;;  %v304_v13 = vld [vmem:[%s513_s4] ss:$0 sm:$0xff]  ;;  %v306_v21 = vld [vmem:[%s513_s4 + $0x1] ss:$0 sm:$0xff]  ;;  %v308_v26 = vld [vmem:[%s513_s4 + $0x2] ss:$0 sm:$0xff]  ;;  %p389_p8 = scmp.ne.s32.totalorder %s296_s27, %s388_s3  ;;  %p394_p10 = scmp.lt.s32.totalorder %s388_s3, %s388_s3 }
  0x18   :  { %351 = vmatpush3.bf16.msra.mxu1 %v350_v6 }
  0x19   :  { %352 = vmatprep.subr.bf16.mxu1 %v417_v1  ;;  %357 = vmatpush3.bf16.msra.mxu0 %v356_v12  ;;  %p395_p11 = por %p394_p10, %p393_p9 }
  0x1a   :  { %358 = vmatprep.subr.bf16.mxu0 %v417_v1 }
  0x1b   :  { %p396_p12 = pnand %p395_p11, %p389_p8 }
  0x1c   :  { %354 = vmatpush3.bf16.msra.mxu1 %v353_v9 }
  0x1d   :  { %360 = vmatpush3.bf16.msra.mxu0 %v359_v20 }
  0xe9   :  { %v114_v14 = vpop.f32.mrb[0].mxu0 }
  0xea   :  { %v115_v15 = vadd.f32 %v304_v13, %v114_v14  ;;  %v326_v16 = vpop.f32.mrb[1].mxu0 }
  0xec   :  { %v118_v17 = vmax.f32 %v115_v15, 0.0 }
  0xee   :  { %336 = vmatmul.mubr.msk.f32.vlgmr.msra.gmra.mrb[0].mxu1 %vm129_vm2, %v118_v17 }
 0x1c1   :  { %v199_v22 = vpop.f32.mrb[0].mxu1 }
 0x1c2   :  { %v200_v23 = vadd.f32 %v306_v21, %v199_v22  ;;  %v337_v24 = vpop.f32.mrb[1].mxu1 }
 0x1c4   :  { %v203_v25 = vmax.f32 %v200_v23, 0.0 }
 0x1c6   :  { %347 = vmatmul.mubr.msk.f32.vlgmr.msra.gmra.mrb[2].mxu0 %vm129_vm2, %v203_v25 }
 0x299   :  { %v283_v27 = vpop.f32.mrb[2].mxu0 }
 0x29a   :  { %v284_v28 = vadd.f32 %v308_v26, %v283_v27  ;;  %v348_v29 = vpop.f32.mrb[3].mxu0 }
 0x29c   :  { %288 = vst.msk [vmem:[#allocation5] sm:$0xf] %vm287_vm3, %v284_v28 }
 0x29d   :  { %399 = shalt.err (!%p396_p12)
}
 0x29e   :  { %s400_s30 = scalar_lea.hbm %s514_s5, 64 }
 0x29f   :  { %p401_p13 = scmp.ne.s32.totalorder %s514_s5, %s400_s30  ;;  %p404_p0 = scmp.lt.u32.totalorder %s400_s30, %s514_s5 }
 0x2a1   :  { %p406_p1 = pnand %p404_p0, %p401_p13 }
 0x2a3   :  { %409 = shalt.err (!%p406_p1)
}
 0x2a4   :  { %298 = dma.vmem_to_hbm [thread:$0]  %s296_s27, 64, %s514_s5, [#allocation4]  }
 0x2a5   :  { %412 = dma.done.wait [#allocation4], 64  }
 0x2a6   :  { %413 = vsyncadd [#allocation4], 4294967232 }
 0x2a7   :  { %302 = vsyncpa [#allocation3], 1 }
 0x2a8   :  { %303 = vsyncpa [#allocation4], 1 }

</bundles_post_ra>
